<compile_context>
chip_gen: v6e
topology: v6e:2x2x1
jax: 0.10.0
libtpu: 0.0.40
codegen_flags: <defaults>
</compile_context>

<pallas_src>
import functools

import jax
import jax.numpy as jnp
from jax.experimental import pallas as pl
from jax.experimental.pallas import tpu as pltpu

_EPS = 1e-5
_TILE_BYTES_BUDGET = 20 * 1024 * 1024   # budget for row-tiled operands (double-buffered)
_VMEM_LIMIT_BYTES = 48 * 1024 * 1024    # safe on v5e/v6e (128 MiB phys) and v7x (64 MiB phys)


# ---------------------------------------------------------------------------
# Pallas kernels (matmul on MXU + bias / shortcut / ReLU epilogue in f32)
# ---------------------------------------------------------------------------
def _conv_bias_kernel(p_ref, w_ref, b_ref, o_ref, *, relu):
    acc = jnp.dot(p_ref[...], w_ref[...], preferred_element_type=jnp.float32)
    y = acc + b_ref[...]
    if relu:
        y = jnp.maximum(y, 0.0)
    o_ref[...] = y.astype(o_ref.dtype)


def _conv_bias_add_relu_kernel(p_ref, w_ref, b_ref, r_ref, o_ref):
    # identity shortcut: residual tile streamed in, added in f32
    acc = jnp.dot(p_ref[...], w_ref[...], preferred_element_type=jnp.float32)
    y = acc + b_ref[...] + r_ref[...].astype(jnp.float32)
    o_ref[...] = jnp.maximum(y, 0.0).astype(o_ref.dtype)


def _conv_bias_shortcut_relu_kernel(p_ref, w_ref, b_ref, xs_ref, wsc_ref, o_ref):
    # downsampling shortcut: 1x1 conv (+ its folded BN) computed in-kernel
    acc = jnp.dot(p_ref[...], w_ref[...], preferred_element_type=jnp.float32)
    sc = jnp.dot(xs_ref[...], wsc_ref[...], preferred_element_type=jnp.float32)
    y = acc + sc + b_ref[...]
    o_ref[...] = jnp.maximum(y, 0.0).astype(o_ref.dtype)


# ---------------------------------------------------------------------------
# Tiling helpers
# ---------------------------------------------------------------------------
def _round_up(x, m):
    return ((x + m - 1) // m) * m


def _choose_tile_m(m, bytes_per_row, budget):
    """Largest row tile whose (double-buffered) footprint fits the budget."""
    budget = max(budget, 1 << 20)
    tile = 8
    for cand in (1024, 512, 256, 128, 64, 32, 16, 8):
        if cand * bytes_per_row <= budget:
            tile = cand
            break
    tile = min(tile, _round_up(m, 8))
    # keep at least 2 grid steps so "parallel" dimension_semantics can split
    # work across TensorCores (matters on v7x's 2-TC chips)
    if _round_up(m, tile) // tile < 2 and m > 8:
        tile = max(8, _round_up(pl.cdiv(m, 2), 8))
    return tile


def _mosaic_params():
    return pltpu.CompilerParams(
        dimension_semantics=("parallel",),
        vmem_limit_bytes=_VMEM_LIMIT_BYTES,
    )


def _pad_rows(a, rows):
    pad = rows - a.shape[0]
    return a if pad == 0 else jnp.pad(a, ((0, pad), (0, 0)))


def _pad_cols(a, cols):
    pad = cols - a.shape[-1]
    return a if pad == 0 else jnp.pad(a, ((0, 0), (0, pad)))


# ---------------------------------------------------------------------------
# pallas_call wrappers
# ---------------------------------------------------------------------------
def _fused_conv_bn(patches, w, bias, *, relu, out_dtype):
    m, k = patches.shape
    cout = w.shape[1]
    fixed = w.size * w.dtype.itemsize + bias.size * bias.dtype.itemsize
    per_row = (2 * k * patches.dtype.itemsize
               + 2 * cout * jnp.dtype(out_dtype).itemsize)
    tile_m = _choose_tile_m(m, per_row, _TILE_BYTES_BUDGET - fixed)
    m_pad = _round_up(m, tile_m)
    patches = _pad_rows(patches, m_pad)
    out = pl.pallas_call(
        functools.partial(_conv_bias_kernel, relu=relu),
        out_shape=jax.ShapeDtypeStruct((m_pad, cout), out_dtype),
        grid=(m_pad // tile_m,),
        in_specs=[
            pl.BlockSpec((tile_m, k), lambda i: (i, 0)),
            pl.BlockSpec(memory_space=pltpu.MemorySpace.VMEM),  # weights: single copy
            pl.BlockSpec(memory_space=pltpu.MemorySpace.VMEM),  # bias: single copy
        ],
        out_specs=pl.BlockSpec((tile_m, cout), lambda i: (i, 0)),
        compiler_params=_mosaic_params(),
    )(patches, w, bias)
    return out[:m]


def _fused_conv_bn_add_relu(patches, w, bias, residual):
    m, k = patches.shape
    cout = w.shape[1]
    fixed = w.size * w.dtype.itemsize + bias.size * bias.dtype.itemsize
    per_row = (2 * k * patches.dtype.itemsize
               + 2 * cout * residual.dtype.itemsize
               + 2 * cout * 4)
    tile_m = _choose_tile_m(m, per_row, _TILE_BYTES_BUDGET - fixed)
    m_pad = _round_up(m, tile_m)
    patches = _pad_rows(patches, m_pad)
    residual = _pad_rows(residual, m_pad)
    out = pl.pallas_call(
        _conv_bias_add_relu_kernel,
        out_shape=jax.ShapeDtypeStruct((m_pad, cout), jnp.float32),
        grid=(m_pad // tile_m,),
        in_specs=[
            pl.BlockSpec((tile_m, k), lambda i: (i, 0)),
            pl.BlockSpec(memory_space=pltpu.MemorySpace.VMEM),
            pl.BlockSpec(memory_space=pltpu.MemorySpace.VMEM),
            pl.BlockSpec((tile_m, cout), lambda i: (i, 0)),
        ],
        out_specs=pl.BlockSpec((tile_m, cout), lambda i: (i, 0)),
        compiler_params=_mosaic_params(),
    )(patches, w, bias, residual)
    return out[:m]


def _fused_conv_bn_shortcut_relu(patches, w, bias, xs, wsc):
    m, k = patches.shape
    cout = w.shape[1]
    cin = xs.shape[1]
    fixed = (w.size * w.dtype.itemsize + wsc.size * wsc.dtype.itemsize
             + bias.size * bias.dtype.itemsize)
    per_row = (2 * k * patches.dtype.itemsize
               + 2 * cin * xs.dtype.itemsize
               + 2 * cout * 4)
    tile_m = _choose_tile_m(m, per_row, _TILE_BYTES_BUDGET - fixed)
    m_pad = _round_up(m, tile_m)
    patches = _pad_rows(patches, m_pad)
    xs = _pad_rows(xs, m_pad)
    out = pl.pallas_call(
        _conv_bias_shortcut_relu_kernel,
        out_shape=jax.ShapeDtypeStruct((m_pad, cout), jnp.float32),
        grid=(m_pad // tile_m,),
        in_specs=[
            pl.BlockSpec((tile_m, k), lambda i: (i, 0)),
            pl.BlockSpec(memory_space=pltpu.MemorySpace.VMEM),
            pl.BlockSpec(memory_space=pltpu.MemorySpace.VMEM),
            pl.BlockSpec((tile_m, cin), lambda i: (i, 0)),
            pl.BlockSpec(memory_space=pltpu.MemorySpace.VMEM),
        ],
        out_specs=pl.BlockSpec((tile_m, cout), lambda i: (i, 0)),
        compiler_params=_mosaic_params(),
    )(patches, w, bias, xs, wsc)
    return out[:m]


# ---------------------------------------------------------------------------
# Glue: im2col, BN folding, parameter setup
# ---------------------------------------------------------------------------
def _im2col(x_nhwc, k, stride, pad):
    n, h, w, c = x_nhwc.shape
    xp = jnp.pad(x_nhwc, ((0, 0), (pad, pad), (pad, pad), (0, 0)))
    hout = (h + 2 * pad - k) // stride + 1
    wout = (w + 2 * pad - k) // stride + 1
    cols = []
    for ky in range(k):
        for kx in range(k):
            cols.append(
                xp[:, ky:ky + stride * (hout - 1) + 1:stride,
                      kx:kx + stride * (wout - 1) + 1:stride, :])
    patches = jnp.concatenate(cols, axis=-1)  # (ky, kx, c) ordering on last axis
    return patches.reshape(n * hout * wout, k * k * c), hout, wout


def _fold_bn(gamma, beta, mean, var, eps=_EPS):
    scale = gamma / jnp.sqrt(var + eps)
    bias = beta - mean * scale
    return scale.reshape(1, -1), bias.reshape(1, -1)


def _w_oihw_to_matmul(w_oihw):
    # [Cout, Cin, kh, kw] -> [kh*kw*Cin, Cout], matching im2col (ky, kx, c) order.
    cout, cin, kh, kw = w_oihw.shape
    return jnp.transpose(w_oihw, (2, 3, 1, 0)).reshape(kh * kw * cin, cout)


def residual_block_forward(x_nchw, params, stride):
    x = jnp.transpose(x_nchw, (0, 2, 3, 1)).astype(jnp.float32)  # NHWC
    n, h, w, cin = x.shape
    cout = params["w1"].shape[0]
    cout_p = _round_up(cout, 128)  # lane-dense outputs

    # ---- left branch, conv1: 3x3(stride) + BN + ReLU -----------------------
    p1, h1, w1 = _im2col(x.astype(jnp.bfloat16), 3, stride, 1)
    s1, b1 = _fold_bn(params["g1"], params["b1"], params["m1"], params["v1"])
    w1m = _pad_cols(_w_oihw_to_matmul(params["w1"]) * s1, cout_p).astype(jnp.bfloat16)
    b1p = _pad_cols(b1, cout_p)
    out1 = _fused_conv_bn(p1, w1m, b1p, relu=True, out_dtype=jnp.bfloat16)
    out1_nhwc = out1[:, :cout].reshape(n, h1, w1, cout)

    # ---- left branch, conv2: 3x3(stride 1) + BN, fused shortcut add + ReLU --
    p2, h2, w2 = _im2col(out1_nhwc, 3, 1, 1)
    s2, b2 = _fold_bn(params["g2"], params["b2"], params["m2"], params["v2"])
    w2m = _pad_cols(_w_oihw_to_matmul(params["w2"]) * s2, cout_p).astype(jnp.bfloat16)
    b2p = _pad_cols(b2, cout_p)

    if stride != 1 or cin != cout:
        # 1x1 shortcut conv + BN fused into the second kernel (no HBM round-trip)
        xs = x[:, ::stride, ::stride, :].reshape(n * h1 * w1, cin).astype(jnp.bfloat16)
        ssc, bsc = _fold_bn(params["gsc"], params["bsc"], params["msc"], params["vsc"])
        wscm = _pad_cols(_w_oihw_to_matmul(params["wsc"]) * ssc, cout_p).astype(jnp.bfloat16)
        bias_tot = b2p + _pad_cols(bsc, cout_p)
        out = _fused_conv_bn_shortcut_relu(p2, w2m, bias_tot, xs, wscm)
    else:
        residual = _pad_cols(x.reshape(n * h1 * w1, cout), cout_p)
        out = _fused_conv_bn_add_relu(p2, w2m, b2p, residual)

    out = out[:, :cout].reshape(n, h2, w2, cout)
    return jnp.transpose(out, (0, 3, 1, 2)).astype(jnp.float32)  # back to NCHW


# ---------------------------------------------------------------------------
# Pure-JAX reference (lax.conv, f32) for correctness check
# ---------------------------------------------------------------------------
def _ref_forward(x, params, stride, eps=_EPS):
    def conv(xx, ww, s, pad):
        return jax.lax.conv_general_dilated(
            xx, ww, (s, s), padding=[(pad, pad), (pad, pad)],
            dimension_numbers=("NCHW", "OIHW", "NCHW"))

    def bn(xx, g, b, m, v):
        g, b, m, v = (t[None, :, None, None] for t in (g, b, m, v))
        return (xx - m) / jnp.sqrt(v + eps) * g + b

    out = jax.nn.relu(bn(conv(x, params["w1"], stride, 1),
                         params["g1"], params["b1"], params["m1"], params["v1"]))
    out = bn(conv(out, params["w2"], 1, 1),
             params["g2"], params["b2"], params["m2"], params["v2"])
    cin, cout = params["w1"].shape[1], params["w1"].shape[0]
    if stride != 1 or cin != cout:
        sc = bn(conv(x, params["wsc"], stride, 0),
                params["gsc"], params["bsc"], params["msc"], params["vsc"])
    else:
        sc = x
    return jax.nn.relu(out + sc)


# ---------------------------------------------------------------------------
def _make_params(key, inchannel, outchannel, stride):
    ks = jax.random.split(key, 16)
    p = {
        "w1": 0.1 * jax.random.normal(ks[0], (outchannel, inchannel, 3, 3), jnp.float32),
        "g1": jax.random.uniform(ks[1], (outchannel,), jnp.float32, 0.5, 1.5),
        "b1": 0.1 * jax.random.normal(ks[2], (outchannel,), jnp.float32),
        "m1": 0.1 * jax.random.normal(ks[3], (outchannel,), jnp.float32),
        "v1": jax.random.uniform(ks[4], (outchannel,), jnp.float32, 0.5, 1.5),
        "w2": 0.1 * jax.random.normal(ks[5], (outchannel, outchannel, 3, 3), jnp.float32),
        "g2": jax.random.uniform(ks[6], (outchannel,), jnp.float32, 0.5, 1.5),
        "b2": 0.1 * jax.random.normal(ks[7], (outchannel,), jnp.float32),
        "m2": 0.1 * jax.random.normal(ks[8], (outchannel,), jnp.float32),
        "v2": jax.random.uniform(ks[9], (outchannel,), jnp.float32, 0.5, 1.5),
    }
    if stride != 1 or inchannel != outchannel:
        p.update({
            "wsc": 0.1 * jax.random.normal(ks[10], (outchannel, inchannel, 1, 1), jnp.float32),
            "gsc": jax.random.uniform(ks[11], (outchannel,), jnp.float32, 0.5, 1.5),
            "bsc": 0.1 * jax.random.normal(ks[12], (outchannel,), jnp.float32),
            "msc": 0.1 * jax.random.normal(ks[13], (outchannel,), jnp.float32),
            "vsc": jax.random.uniform(ks[14], (outchannel,), jnp.float32, 0.5, 1.5),
        })
    return p


if __name__ == "__main__":
    key = jax.random.PRNGKey(0)
    k_x, k_p = jax.random.split(key)

    inchannel, outchannel, stride = 4, 8, 2
    x = jax.random.normal(k_x, (2, inchannel, 16, 16), jnp.float32)  # NCHW
    params = _make_params(k_p, inchannel, outchannel, stride)

    out = jax.jit(functools.partial(residual_block_forward, stride=stride))(x, params)
    out = jax.block_until_ready(out)

    ref = jax.block_until_ready(_ref_forward(x, params, stride))
    assert out.shape == ref.shape == (2, outchannel, 8, 8), (out.shape, ref.shape)
    # bf16 MXU operands -> looser tolerance vs the f32 reference
    if not jnp.allclose(out, ref, atol=5e-2, rtol=5e-2):
        raise AssertionError("Pallas ResidualBlock mismatch vs JAX reference")

    print("KERNEL_OK")
</pallas_src>

<mosaic_0001>
module attributes {stable_mosaic.version = 11 : i64} {
  func.func @_conv_bias_kernel(%arg0: i32, %arg1: memref<64x36xbf16, #tpu.memory_space<vmem>>, %arg2: memref<36x128xbf16, #tpu.memory_space<vmem>>, %arg3: memref<1x128xf32, #tpu.memory_space<vmem>>, %arg4: memref<64x128xbf16, #tpu.memory_space<vmem>>) attributes {dimension_semantics = [#tpu.dimension_semantics<parallel>], iteration_bounds = array<i64: 2>, scalar_prefetch = 0 : i64, scratch_operands = 0 : i64, tpu.core_type = #tpu.core_type<tc>, window_params = [{transform_indices = @transform_0, window_bounds = array<i64: 64, 36>}, {pipeline_mode = #tpu.pipeline_mode<synchronous>, transform_indices = @transform_1, window_bounds = array<i64: 36, 128>}, {pipeline_mode = #tpu.pipeline_mode<synchronous>, transform_indices = @transform_2, window_bounds = array<i64: 1, 128>}, {transform_indices = @transform_3, window_bounds = array<i64: 64, 128>}]} {
    %c0 = arith.constant 0 : index
    %c0_0 = arith.constant 0 : index
    %0 = vector.load %arg1[%c0, %c0_0] : memref<64x36xbf16, #tpu.memory_space<vmem>>, vector<64x36xbf16>
    %c0_1 = arith.constant 0 : index
    %c0_2 = arith.constant 0 : index
    %1 = vector.load %arg2[%c0_1, %c0_2] : memref<36x128xbf16, #tpu.memory_space<vmem>>, vector<36x128xbf16>
    %cst = arith.constant dense<0.000000e+00> : vector<64x128xf32>
    %2 = tpu.matmul %0, %1, %cst {dimension_numbers = #tpu.dot_dimension_numbers<[1], [0], [0], [1], [0, 0, 1, 1], [], []>} : vector<64x36xbf16>, vector<36x128xbf16>, vector<64x128xf32> -> vector<64x128xf32>
    %c0_3 = arith.constant 0 : index
    %c0_4 = arith.constant 0 : index
    %3 = vector.load %arg3[%c0_3, %c0_4] : memref<1x128xf32, #tpu.memory_space<vmem>>, vector<1x128xf32>
    %4 = vector.broadcast %3 : vector<1x128xf32> to vector<64x128xf32>
    %5 = arith.addf %2, %4 : vector<64x128xf32>
    %cst_5 = arith.constant 0.000000e+00 : f32
    %6 = vector.broadcast %cst_5 : f32 to vector<64x128xf32>
    %7 = arith.maximumf %5, %6 : vector<64x128xf32>
    %8 = arith.truncf %7 : vector<64x128xf32> to vector<64x128xbf16>
    %c0_6 = arith.constant 0 : index
    %c0_7 = arith.constant 0 : index
    %9 = vector.load %arg4[%c0_6, %c0_7] : memref<64x128xbf16, #tpu.memory_space<vmem>>, vector<64x128xbf16>
    tpu.vector_store %arg4[%c0_6, %c0_7], %8 {strides = array<i32>} : memref<64x128xbf16, #tpu.memory_space<vmem>>, vector<64x128xbf16>,
    return
  }
  func.func @transform_0(%arg0: i32) -> (i32, i32) {
    %c0_i32 = arith.constant 0 : i32
    %c0_i32_0 = arith.constant 0 : i32
    return %arg0, %c0_i32 : i32, i32
  }
  func.func @transform_1(%arg0: i32) -> (i32, i32) {
    %c0_i32 = arith.constant 0 : i32
    %c0_i32_0 = arith.constant 0 : i32
    %c0_i32_1 = arith.constant 0 : i32
    return %c0_i32, %c0_i32_0 : i32, i32
  }
  func.func @transform_2(%arg0: i32) -> (i32, i32) {
    %c0_i32 = arith.constant 0 : i32
    %c0_i32_0 = arith.constant 0 : i32
    %c0_i32_1 = arith.constant 0 : i32
    return %c0_i32, %c0_i32_0 : i32, i32
  }
  func.func @transform_3(%arg0: i32) -> (i32, i32) {
    %c0_i32 = arith.constant 0 : i32
    %c0_i32_0 = arith.constant 0 : i32
    return %arg0, %c0_i32 : i32, i32
  }
}

module attributes {stable_mosaic.version = 11 : i64} {
  func.func @_conv_bias_shortcut_relu_kernel(%arg0: i32, %arg1: memref<64x72xbf16, #tpu.memory_space<vmem>>, %arg2: memref<72x128xbf16, #tpu.memory_space<vmem>>, %arg3: memref<1x128xf32, #tpu.memory_space<vmem>>, %arg4: memref<64x4xbf16, #tpu.memory_space<vmem>>, %arg5: memref<4x128xbf16, #tpu.memory_space<vmem>>, %arg6: memref<64x128xf32, #tpu.memory_space<vmem>>) attributes {dimension_semantics = [#tpu.dimension_semantics<parallel>], iteration_bounds = array<i64: 2>, scalar_prefetch = 0 : i64, scratch_operands = 0 : i64, tpu.core_type = #tpu.core_type<tc>, window_params = [{transform_indices = @transform_0, window_bounds = array<i64: 64, 72>}, {pipeline_mode = #tpu.pipeline_mode<synchronous>, transform_indices = @transform_1, window_bounds = array<i64: 72, 128>}, {pipeline_mode = #tpu.pipeline_mode<synchronous>, transform_indices = @transform_2, window_bounds = array<i64: 1, 128>}, {transform_indices = @transform_3, window_bounds = array<i64: 64, 4>}, {pipeline_mode = #tpu.pipeline_mode<synchronous>, transform_indices = @transform_4, window_bounds = array<i64: 4, 128>}, {transform_indices = @transform_5, window_bounds = array<i64: 64, 128>}]} {
    %c0 = arith.constant 0 : index
    %c0_0 = arith.constant 0 : index
    %0 = vector.load %arg1[%c0, %c0_0] : memref<64x72xbf16, #tpu.memory_space<vmem>>, vector<64x72xbf16>
    %c0_1 = arith.constant 0 : index
    %c0_2 = arith.constant 0 : index
    %1 = vector.load %arg2[%c0_1, %c0_2] : memref<72x128xbf16, #tpu.memory_space<vmem>>, vector<72x128xbf16>
    %cst = arith.constant dense<0.000000e+00> : vector<64x128xf32>
    %2 = tpu.matmul %0, %1, %cst {dimension_numbers = #tpu.dot_dimension_numbers<[1], [0], [0], [1], [0, 0, 1, 1], [], []>} : vector<64x72xbf16>, vector<72x128xbf16>, vector<64x128xf32> -> vector<64x128xf32>
    %c0_3 = arith.constant 0 : index
    %c0_4 = arith.constant 0 : index
    %3 = vector.load %arg4[%c0_3, %c0_4] : memref<64x4xbf16, #tpu.memory_space<vmem>>, vector<64x4xbf16>
    %c0_5 = arith.constant 0 : index
    %c0_6 = arith.constant 0 : index
    %4 = vector.load %arg5[%c0_5, %c0_6] : memref<4x128xbf16, #tpu.memory_space<vmem>>, vector<4x128xbf16>
    %cst_7 = arith.constant dense<0.000000e+00> : vector<64x128xf32>
    %5 = tpu.matmul %3, %4, %cst_7 {dimension_numbers = #tpu.dot_dimension_numbers<[1], [0], [0], [1], [0, 0, 1, 1], [], []>} : vector<64x4xbf16>, vector<4x128xbf16>, vector<64x128xf32> -> vector<64x128xf32>
    %6 = arith.addf %2, %5 : vector<64x128xf32>
    %c0_8 = arith.constant 0 : index
    %c0_9 = arith.constant 0 : index
    %7 = vector.load %arg3[%c0_8, %c0_9] : memref<1x128xf32, #tpu.memory_space<vmem>>, vector<1x128xf32>
    %8 = vector.broadcast %7 : vector<1x128xf32> to vector<64x128xf32>
    %9 = arith.addf %6, %8 : vector<64x128xf32>
    %cst_10 = arith.constant 0.000000e+00 : f32
    %10 = vector.broadcast %cst_10 : f32 to vector<64x128xf32>
    %11 = arith.maximumf %9, %10 : vector<64x128xf32>
    %c0_11 = arith.constant 0 : index
    %c0_12 = arith.constant 0 : index
    %12 = vector.load %arg6[%c0_11, %c0_12] : memref<64x128xf32, #tpu.memory_space<vmem>>, vector<64x128xf32>
    tpu.vector_store %arg6[%c0_11, %c0_12], %11 {strides = array<i32>} : memref<64x128xf32, #tpu.memory_space<vmem>>, vector<64x128xf32>,
    return
  }
  func.func @transform_0(%arg0: i32) -> (i32, i32) {
    %c0_i32 = arith.constant 0 : i32
    %c0_i32_0 = arith.constant 0 : i32
    return %arg0, %c0_i32 : i32, i32
  }
  func.func @transform_1(%arg0: i32) -> (i32, i32) {
    %c0_i32 = arith.constant 0 : i32
    %c0_i32_0 = arith.constant 0 : i32
    %c0_i32_1 = arith.constant 0 : i32
    return %c0_i32, %c0_i32_0 : i32, i32
  }
  func.func @transform_2(%arg0: i32) -> (i32, i32) {
    %c0_i32 = arith.constant 0 : i32
    %c0_i32_0 = arith.constant 0 : i32
    %c0_i32_1 = arith.constant 0 : i32
    return %c0_i32, %c0_i32_0 : i32, i32
  }
  func.func @transform_3(%arg0: i32) -> (i32, i32) {
    %c0_i32 = arith.constant 0 : i32
    %c0_i32_0 = arith.constant 0 : i32
    return %arg0, %c0_i32 : i32, i32
  }
  func.func @transform_4(%arg0: i32) -> (i32, i32) {
    %c0_i32 = arith.constant 0 : i32
    %c0_i32_0 = arith.constant 0 : i32
    %c0_i32_1 = arith.constant 0 : i32
    return %c0_i32, %c0_i32_0 : i32, i32
  }
  func.func @transform_5(%arg0: i32) -> (i32, i32) {
    %c0_i32 = arith.constant 0 : i32
    %c0_i32_0 = arith.constant 0 : i32
    return %arg0, %c0_i32 : i32, i32
  }
}

</mosaic_0001>

<bundles_post_ra>
// kernel: residual_block_forward.2
= control target key start
LH: loop header
LB: loop body
LE: loop exit
PB: predicated region body
PF: predicated region fallthrough
CT: control target
= control target key end

     0   :  { %s550_s12 = smov 0   ;;  %s586_s0 = inlined_call_operand.vmem [shape: bf16[128,36], index: 0, kind: input, shape index: {}]   ;;  %s587_s1 = inlined_call_operand.vmem [shape: bf16[36,128], index: 1, kind: input, shape index: {}]   ;;  %s588_s2 = inlined_call_operand.vmem [shape: f32[1,128], index: 2, kind: input, shape index: {}]   ;;  %s589_s3 = inlined_call_operand.vmem [shape: bf16[128,128], index: 3, kind: output, shape index: {}]  }
   0x1 LB: > { %s416_s13 = sadd.s32 4294967295, %s528_s12   ;;  %p420_p0 = scmp.ge.s32.totalorder %s528_s12, 1  ;;  %s528_s12 = sphi %s550_s12, %s13_s12  }
   0x2   : > { %p138_p1 = scmp.lt.s32.totalorder %s528_s12, 3 }
   0x4   : > { %p139_p2 = pnand %p420_p0, %p138_p1 }
   0x5   : > { %s421_s18 = sshll.u32 (!%p139_p2), %s416_s13, 3 }
   0x6   : > { %142 = sbr.rel (%p139_p2) target bundleno = 230 (0xe6), region = 32  ;;  %p163_p3 = scmp.lt.s32.totalorder (!%p139_p2), %s421_s18, 15 }
   0xb   : > { %v515_v0 = vld [vmem:[%s587_s1 + $0x10] ss:$0 sps:$4 sm:$0x33]   ;;  %vm243_vm0 = vcmask 1041408   ;;  %v516_v1 = vld [vmem:[%s587_s1 + $0x8] sm:$0xff]   ;;  %v517_v3 = vld [vmem:[%s587_s1] sm:$0xff]  }
   0xc   : > { %505 = vmatprep.subr.msk.bf16.mxu0 %vm243_vm0, %v515_v0  ;;  %506 = vmatprep.subr.msk.bf16.mxu1 %vm243_vm0, %v515_v0  ;;  %v245_v2 = vsel %vm243_vm0, %v515_v0, 0  ;;  %s591_s18 = smov (!%p163_p3, %s421_s18), 15  ;;  %vm230_vm1 = vcmask 293888   ;;  %v425_v8 = vld [vmem:[%s588_s2] ss:$0 sm:$0xff] }
   0xd   : > { %486 = vmatpush3.bf16.msra.mxu0 %v245_v2  ;;  %502 = vmatpush3.bf16.msra.mxu1 %v245_v2  ;;  %s422_s21 = sshll.u32 %s591_s18, 2 }
   0xe   : > { %487 = vmatprep.subr.bf16.mxu0 %v516_v1  ;;  %500 = vmatprep.subr.bf16.mxu1 %v516_v1  ;;  %s166_s24 = scalar_lea.vmem %s586_s0, %s422_s21  ;;  %s172_s29 = scalar_lea.vmem %s589_s3, %s422_s21 }
   0xf   : > { %v518_v4 = vld [vmem:[%s166_s24] sm:$0xff]   ;;  %v519_v5 = vld [vmem:[%s166_s24 + $0x10] sm:$0xff]   ;;  %v520_v6 = vld [vmem:[%s166_s24 + $0x8] sm:$0xff]  }
  0x10   : > { %491 = vmatprep.mubr.msk.bf16.mxu0 %vm230_vm1, %v518_v4  ;;  %495 = vmatprep.mubr.msk.bf16.mxu1 %vm230_vm1, %v519_v5  ;;  %v521_v7 = vld [vmem:[%s166_s24 + $0x18] sm:$0xff]  }
  0x11   : > { %488 = vmatpush3.bf16.msra.mxu0 %v516_v1  ;;  %503 = vmatpush3.bf16.msra.mxu1 %v516_v1 }
  0x12   : > { %489 = vmatprep.subr.bf16.mxu0 %v517_v3  ;;  %501 = vmatprep.subr.bf16.mxu1 %v517_v3 }
  0x15   : > { %490 = vmatpush3.bf16.msra.mxu0 %v517_v3  ;;  %504 = vmatpush3.bf16.msra.mxu1 %v517_v3 }
  0x18   : > { %492 = vmatmul.mubr.msk.bf16.vlgmr.msra.gmra.mxu0 %vm230_vm1, %v520_v6  ;;  %496 = vmatmul.mubr.msk.bf16.vlgmr.msra.gmra.mxu1 %vm230_vm1, %v521_v7 }
  0xd8   : > { %v493_v9 = vpop.f32.mrf.mxu0  ;;  %v497_v10 = vpop.f32.mrf.mxu1 }
  0xd9   : > { %v290_v11 = vadd.f32 %v493_v9, %v425_v8  ;;  %v306_v12 = vadd.f32 %v497_v10, %v425_v8 }
  0xda   : > { %v281_v13 = vpop.f32.mrf.mxu0  ;;  %v297_v14 = vpop.f32.mrf.mxu1 }
  0xdb   : > { %v282_v15 = vadd.f32 %v425_v8, %v281_v13  ;;  %v298_v16 = vadd.f32 %v425_v8, %v297_v14  ;;  %v314_v21 = vmax.f32 %v290_v11, 0.0  ;;  %v318_v22 = vmax.f32 %v306_v12, 0.0 }
  0xdc   : > { %v494_v17 = vpop.f32.mrf.mxu0  ;;  %v498_v18 = vpop.f32.mrf.mxu1 }
  0xdd   : > { %v293_v19 = vadd.f32 %v494_v17, %v425_v8  ;;  %v309_v20 = vadd.f32 %v498_v18, %v425_v8  ;;  %v312_v29 = vmax.f32 %v282_v15, 0.0  ;;  %v316_v30 = vmax.f32 %v298_v16, 0.0 }
  0xde   : > { %v284_v23 = vpop.f32.mrf.mxu0  ;;  %v300_v24 = vpop.f32.mrf.mxu1 }
  0xdf   : > { %v315_v25 = vmax.f32 %v293_v19, 0.0  ;;  %v319_v26 = vmax.f32 %v309_v20, 0.0  ;;  %v285_v27 = vadd.f32 %v425_v8, %v284_v23  ;;  %v301_v28 = vadd.f32 %v425_v8, %v300_v24 }
  0xe1   : > { %v463_v31 = vpack.c.bf16 %v315_v25, %v314_v21  ;;  %v473_v32 = vpack.c.bf16 %v319_v26, %v318_v22  ;;  %v313_v33 = vmax.f32 %v285_v27, 0.0  ;;  %v317_v34 = vmax.f32 %v301_v28, 0.0 }
  0xe3   : > { %475 = vst [vmem:[%s172_s29 + $0x8] sm:$0xff] %v463_v31   ;;  %477 = vst [vmem:[%s172_s29 + $0x18] sm:$0xff] %v473_v32   ;;  %v458_v35 = vpack.c.bf16 %v313_v33, %v312_v29  ;;  %v468_v36 = vpack.c.bf16 %v317_v34, %v316_v30 }
  0xe5   : > { %459 = vst [vmem:[%s172_s29] sm:$0xff] %v458_v35   ;;  %476 = vst [vmem:[%s172_s29 + $0x10] sm:$0xff] %v468_v36  }
  0xe6 PF: > { %s13_s12 = sadd.s32 1, %s528_s12  }
  0xe7   : > { %p10_p4 = scmp.ge.s32.totalorder %s13_s12, 4  }
  0xe9   :  { %12 = sbr.rel (!%p10_p4) target bundleno = 1 (0x1), region = 62 }

// kernel: residual_block_forward.3
= control target key start
LH: loop header
LB: loop body
LE: loop exit
PB: predicated region body
PF: predicated region fallthrough
CT: control target
= control target key end

     0   :  { %s756_s18 = smov 0   ;;  %s819_s0 = inlined_call_operand.vmem [shape: bf16[128,72], index: 0, kind: input, shape index: {}]   ;;  %s820_s1 = inlined_call_operand.vmem [shape: bf16[72,128], index: 1, kind: input, shape index: {}]   ;;  %s821_s2 = inlined_call_operand.vmem [shape: f32[1,128], index: 2, kind: input, shape index: {}]   ;;  %s822_s3 = inlined_call_operand.vmem [shape: bf16[128,4], index: 3, kind: input, shape index: {}]   ;;  %s823_s4 = inlined_call_operand.vmem [shape: bf16[4,128], index: 4, kind: input, shape index: {}]   ;;  %s824_s5 = inlined_call_operand.vmem [shape: f32[128,128], index: 5, kind: output, shape index: {}]  }
   0x1 LB: > { %s607_s19 = sadd.s32 4294967295, %s724_s18   ;;  %p611_p0 = scmp.ge.s32.totalorder %s724_s18, 1  ;;  %s724_s18 = sphi %s756_s18, %s15_s18  }
   0x2   : > { %p199_p1 = scmp.lt.s32.totalorder %s724_s18, 3 }
   0x4   : > { %p200_p2 = pnand %p611_p0, %p199_p1 }
   0x5   : > { %s612_s26 = sshll.u32 (!%p200_p2), %s607_s19, 3 }
   0x6   : > { %203 = sbr.rel (%p200_p2) target bundleno = 243 (0xf3), region = 40  ;;  %p233_p3 = scmp.lt.s32.totalorder (!%p200_p2), %s612_s26, 15 }
   0xb   : > { %v705_v0 = vld [vmem:[%s820_s1 + $0x20] ss:$0 sps:$4 sm:$0xff]   ;;  %vm439_vm0 = vcmask 1043456   ;;  %vm310_vm1 = vcmask 1041408   ;;  %v706_v4 = vld [vmem:[%s820_s1 + $0x18] sm:$0xff]   ;;  %v709_v5 = vld [vmem:[%s820_s1 + $0x10] sm:$0xff]  }
   0xc   : > { %v276_v1 = vld [vmem:[%s823_s4] sm:$0x3]  ;;  %696 = vmatprep.subr.msk.bf16.mxu1 %vm439_vm0, %v705_v0  ;;  %v441_v2 = vsel %vm439_vm0, %v705_v0, 0  ;;  %s826_s26 = smov (!%p233_p3, %s612_s26), 15  ;;  %vm297_vm2 = vcmask 31744   ;;  %v710_v6 = vld [vmem:[%s820_s1 + $0x8] sm:$0xff]  }
   0xd   : > { %694 = vmatprep.subr.msk.bf16.mxu0 %vm310_vm1, %v276_v1  ;;  %v312_v3 = vsel %vm310_vm1, %v276_v1, 0  ;;  %689 = vmatpush3.bf16.msra.mxu1 %v441_v2  ;;  %s613_s29 = sshll.u32 %s826_s26, 2  ;;  %v713_v10 = vld [vmem:[%s820_s1] sm:$0xff]   ;;  %vm426_vm3 = vcmask 588800   ;;  %s617_s17 = sshll.u32 %s826_s26, 3 }
   0xe   : > { %657 = vmatpush3.bf16.msra.mxu0 %v312_v3  ;;  %685 = vmatprep.subr.bf16.mxu1 %v706_v4  ;;  %s242_s7 = scalar_lea.vmem %s822_s3, %s613_s29  ;;  %s236_s12 = scalar_lea.vmem %s819_s0, %s613_s29  ;;  %v639_v23 = vld [vmem:[%s821_s2] ss:$0 sm:$0xff] }
   0xf   : > { %695 = vmatprep.subr.msk.bf16.mxu0 %vm439_vm0, %v705_v0  ;;  %v707_v7 = vld [vmem:[%s242_s7] sm:$0xff]   ;;  %v708_v8 = vld [vmem:[%s242_s7 + $0x8] sm:$0xff]   ;;  %v711_v9 = vld [vmem:[%s242_s7 + $0x10] sm:$0xff]   ;;  %s806_s21 = scalar_lea.vmem %s824_s5, %s617_s17 }
  0x10   : > { %658 = vmatprep.mubr.msk.bf16.mxu0 %vm297_vm2, %v707_v7  ;;  %v714_v11 = vld [vmem:[%s236_s12 + $0x10] sm:$0xff]   ;;  %v712_v12 = vld [vmem:[%s242_s7 + $0x18] sm:$0xff]   ;;  %v716_v13 = vld [vmem:[%s236_s12] sm:$0xff]  }
  0x11   : > { %690 = vmatpush3.bf16.msra.mxu1 %v706_v4  ;;  %659 = vmatmul.mubr.msk.bf16.vlgmr.msra.gmra.mxu0 %vm297_vm2, %v708_v8  ;;  %v715_v14 = vld [vmem:[%s236_s12 + $0x18] sm:$0xff]   ;;  %v717_v15 = vld [vmem:[%s236_s12 + $0x8] sm:$0xff]  }
  0x12   : > { %686 = vmatprep.subr.bf16.mxu1 %v709_v5  ;;  %667 = vmatpush3.bf16.msra.mxu0 %v441_v2 }
  0x13   : > { %662 = vmatprep.mubr.msk.bf16.mxu0 %vm297_vm2, %v711_v9  ;;  %668 = vmatprep.subr.bf16.mxu0 %v706_v4 }
  0x14   : > { %680 = vmatprep.mubr.msk.bf16.mxu1 %vm426_vm3, %v714_v11 }
  0x15   : > { %691 = vmatpush3.bf16.msra.mxu1 %v709_v5 }
  0x16   : > { %687 = vmatprep.subr.bf16.mxu1 %v710_v6  ;;  %669 = vmatpush3.bf16.msra.mxu0 %v706_v4 }
  0x17   : > { %670 = vmatprep.subr.bf16.mxu0 %v709_v5 }
  0x19   : > { %692 = vmatpush3.bf16.msra.mxu1 %v710_v6  ;;  %663 = vmatmul.mubr.msk.bf16.gmra.mxu0 %vm297_vm2, %v712_v12 }
  0x1a   : > { %688 = vmatprep.subr.bf16.mxu1 %v713_v10  ;;  %671 = vmatpush3.bf16.msra.mxu0 %v709_v5 }
  0x1b   : > { %676 = vmatprep.mubr.msk.bf16.mxu0 %vm426_vm3, %v716_v13  ;;  %672 = vmatprep.subr.bf16.mxu0 %v710_v6 }
  0x1d   : > { %693 = vmatpush3.bf16.msra.mxu1 %v713_v10 }
  0x1e   : > { %673 = vmatpush3.bf16.msra.mxu0 %v710_v6 }
  0x1f   : > { %674 = vmatprep.subr.bf16.mxu0 %v713_v10 }
  0x20   : > { %681 = vmatmul.mubr.msk.bf16.vlgmr.msra.gmra.mxu1 %vm426_vm3, %v715_v14 }
  0x22   : > { %675 = vmatpush3.bf16.msra.mxu0 %v713_v10 }
  0x25   : > { %677 = vmatmul.mubr.msk.bf16.vlgmr.msra.gmra.mxu0 %vm426_vm3, %v717_v15 }
  0xd1   : > { %v660_v16 = vpop.f32.mrf.mxu0 }
  0xd3   : > { %v348_v17 = vpop.f32.mrf.mxu0 }
  0xd5   : > { %v661_v18 = vpop.f32.mrf.mxu0 }
  0xd7   : > { %v351_v19 = vpop.f32.mrf.mxu0 }
  0xd9   : > { %v664_v20 = vpop.f32.mrf.mxu0 }
  0xdb   : > { %v364_v21 = vpop.f32.mrf.mxu0 }
  0xdd   : > { %v665_v25 = vpop.f32.mrf.mxu0 }
  0xdf   : > { %v367_v33 = vpop.f32.mrf.mxu0 }
  0xe0   : > { %v682_v22 = vpop.f32.mrf.mxu1 }
  0xe1   : > { %v502_v24 = vadd.f32 %v682_v22, %v664_v20 }
  0xe2   : > { %v493_v26 = vpop.f32.mrf.mxu1 }
  0xe3   : > { %v521_v27 = vadd.f32 %v639_v23, %v502_v24  ;;  %v494_v28 = vadd.f32 %v493_v26, %v364_v21 }
  0xe4   : > { %v683_v29 = vpop.f32.mrf.mxu1 }
  0xe5   : > { %v529_v30 = vmax.f32 %v521_v27, 0.0  ;;  %v519_v31 = vadd.f32 %v639_v23, %v494_v28  ;;  %v505_v32 = vadd.f32 %v683_v29, %v665_v25  ;;  %v678_v40 = vpop.f32.mrf.mxu0 }
  0xe6   : > { %v496_v34 = vpop.f32.mrf.mxu1  ;;  %v486_v42 = vadd.f32 %v678_v40, %v660_v16 }
  0xe7   : > { %537 = vst [vmem:[%s806_s21 + $0x30] sm:$0xff] %v529_v30  ;;  %v527_v35 = vmax.f32 %v519_v31, 0.0  ;;  %v522_v36 = vadd.f32 %v639_v23, %v505_v32  ;;  %v497_v37 = vadd.f32 %v496_v34, %v367_v33  ;;  %v477_v43 = vpop.f32.mrf.mxu0 }
  0xe8   : > { %v517_v44 = vadd.f32 %v639_v23, %v486_v42  ;;  %v478_v45 = vadd.f32 %v477_v43, %v348_v17 }
  0xe9   : > { %535 = vst [vmem:[%s806_s21 + $0x20] sm:$0xff] %v527_v35  ;;  %v530_v38 = vmax.f32 %v522_v36, 0.0  ;;  %v520_v39 = vadd.f32 %v639_v23, %v497_v37  ;;  %v679_v46 = vpop.f32.mrf.mxu0 }
  0xea   : > { %v525_v47 = vmax.f32 %v517_v44, 0.0  ;;  %v515_v48 = vadd.f32 %v639_v23, %v478_v45  ;;  %v489_v49 = vadd.f32 %v679_v46, %v661_v18 }
  0xeb   : > { %538 = vst [vmem:[%s806_s21 + $0x38] sm:$0xff] %v530_v38  ;;  %v528_v41 = vmax.f32 %v520_v39, 0.0  ;;  %v480_v50 = vpop.f32.mrf.mxu0 }
  0xec   : > { %533 = vst [vmem:[%s806_s21 + $0x10] sm:$0xff] %v525_v47  ;;  %v523_v51 = vmax.f32 %v515_v48, 0.0  ;;  %v518_v52 = vadd.f32 %v639_v23, %v489_v49  ;;  %v481_v53 = vadd.f32 %v480_v50, %v351_v19 }
  0xed   : > { %536 = vst [vmem:[%s806_s21 + $0x28] sm:$0xff] %v528_v41 }
  0xee   : > { %531 = vst [vmem:[%s806_s21] sm:$0xff] %v523_v51  ;;  %v526_v54 = vmax.f32 %v518_v52, 0.0  ;;  %v516_v55 = vadd.f32 %v639_v23, %v481_v53 }
  0xf0   : > { %534 = vst [vmem:[%s806_s21 + $0x18] sm:$0xff] %v526_v54  ;;  %v524_v56 = vmax.f32 %v516_v55, 0.0 }
  0xf2   : > { %532 = vst [vmem:[%s806_s21 + $0x8] sm:$0xff] %v524_v56 }
  0xf3 PF: > { %s15_s18 = sadd.s32 1, %s724_s18  }
  0xf4   : > { %p12_p4 = scmp.ge.s32.totalorder %s15_s18, 4  }
  0xf6   :  { %14 = sbr.rel (!%p12_p4) target bundleno = 1 (0x1), region = 73 }

</bundles_post_ra>
